<compile_context>
chip_gen: v6e
topology: v6e:2x2x1
jax: 0.10.0
libtpu: 0.0.40
codegen_flags: <defaults>
</compile_context>

<pallas_src>
import jax
import jax.numpy as jnp
from jax.experimental import pallas as pl
from jax.experimental.pallas import tpu as pltpu


def build_grid(resolution):
    """JAX port of build_grid: returns (1, H, W, 4) float32 (channels-last)."""
    ranges = [jnp.linspace(0.0, 1.0, num=res) for res in resolution]
    grid = jnp.meshgrid(*ranges, sparse=False, indexing="ij")
    grid = jnp.stack(grid, axis=-1)
    grid = jnp.reshape(grid, (resolution[0], resolution[1], -1))
    grid = jnp.expand_dims(grid, axis=0).astype(jnp.float32)
    return jnp.concatenate([grid, 1.0 - grid], axis=-1)


def _embed_kernel(x_ref, g_ref, wg_ref, wx_ref, o_ref):
    # x_ref:  (Bt, 3, TS)    input channels, spatial on lanes
    # g_ref:  (5, TS)        positional channels [h, w, 1-h, 1-w, 1]
    # wg_ref: (HID, 5)       weight columns for grid channels (+ bias column)
    # wx_ref: (HID, 3)       weight columns for input channels
    # o_ref:  (Bt, HID, TS)  output block, already in (B, hidden, H*W) layout
    hi = jax.lax.Precision.HIGHEST
    # Positional + bias contribution, shared by every batch element in block.
    pos = jnp.dot(wg_ref[...], g_ref[...],
                  preferred_element_type=jnp.float32, precision=hi)
    for b in range(x_ref.shape[0]):        # Bt is a small static constant
        o_ref[b] = (pos + jnp.dot(wx_ref[...], x_ref[b],
                                  preferred_element_type=jnp.float32,
                                  precision=hi)).astype(o_ref.dtype)


def _choose_tiling(B, hidden, HW):
    """Generation-aware (TS, Bt, vmem_limit_bytes) selection."""
    try:
        vmem_cap = int(pltpu.get_tpu_info().vmem_capacity_bytes)
    except Exception:
        vmem_cap = 64 << 20            # conservative: v7x per-TC physical VMEM

    # Total double-buffered footprint target, and the scoped limit we request.
    footprint_budget = min(vmem_cap // 2, 48 << 20)
    vmem_limit = int(min(vmem_cap - (8 << 20), footprint_budget + (16 << 20)))

    hid_pad = -(-hidden // 8) * 8

    def footprint(bt, ts):
        # double-buffered: x (C=3 padded to 8 sublanes) + grid (5->8) + output
        return 2 * 4 * ts * (bt * (hid_pad + 8) + 8)

    if HW < 128:
        ts = HW                        # full-extent spatial block (always legal)
    else:
        budget_ts = max(128, (footprint_budget // footprint(1, 1)) // 128 * 128)
        ts = min(budget_ts, (HW // 128) * 128)

    bt = 1
    for cand in (2, 4, 8):
        if B % cand == 0 and footprint(cand, ts) <= footprint_budget:
            bt = cand

    # Keep >= 2 grid steps on a parallel axis so v7x's 2 TensorCores both work.
    n_sp = -(-HW // ts)
    while n_sp * (B // bt) < 2 and bt > 1:
        bt //= 2
    if n_sp * (B // bt) < 2 and ts >= 256 and ts % 128 == 0:
        ts = max(128, (ts // 2) // 128 * 128)

    return ts, bt, vmem_limit


def soft_position_embed(inputs, weight, bias, *, out_dtype=jnp.float32):
    """Forward of SoftPositionEmbed.

    inputs: (B, 3, H, W) NCHW.
    weight: (hidden, 7) -- native PyTorch nn.Linear weight layout.
    bias:   (hidden,).
    Returns (B, hidden, H, W) in `out_dtype` (default f32, matching PyTorch).
    """
    B, C, H, W = inputs.shape
    hidden, K = weight.shape
    assert K == C + 4 == 7, "SoftPositionEmbed expects 3 input + 4 grid channels"
    HW = H * W

    TS, BT, vmem_limit = _choose_tiling(B, hidden, HW)
    n_sp = pl.cdiv(HW, TS)
    n_b = B // BT

    # Free reshape: collapse trailing spatial dims so spatial is the lane axis.
    x = inputs.reshape(B, C, HW).astype(jnp.float32)

    # Positional grid in (channel, spatial) layout: rows [h, w, 1-h, 1-w, 1].
    gh = jnp.linspace(0.0, 1.0, H, dtype=jnp.float32)
    gw = jnp.linspace(0.0, 1.0, W, dtype=jnp.float32)
    row_h = jnp.repeat(gh, W)                  # h varies slowly (indexing='ij')
    row_w = jnp.tile(gw, H)                    # w varies fast
    grid_t = jnp.stack(
        [row_h, row_w, 1.0 - row_h, 1.0 - row_w, jnp.ones_like(row_h)], axis=0)

    w = weight.astype(jnp.float32)
    # Fold the bias into the grid dot via the extra "ones" channel.
    w_grid = jnp.concatenate(
        [w[:, :4], bias.reshape(hidden, 1).astype(jnp.float32)], axis=1)  # (hid, 5)
    w_in = w[:, 4:]                                                       # (hid, 3)

    cost = pl.CostEstimate(
        flops=2 * B * HW * K * hidden,
        transcendentals=0,
        bytes_accessed=4 * (x.size + grid_t.size + w.size + bias.size)
        + B * hidden * HW * jnp.dtype(out_dtype).itemsize,
    )

    out = pl.pallas_call(
        _embed_kernel,
        out_shape=jax.ShapeDtypeStruct((B, hidden, HW), out_dtype),
        grid_spec=pltpu.PrefetchScalarGridSpec(
            num_scalar_prefetch=0,
            # Spatial tiles outer, batch inner: positional-grid / weight block
            # indices are constant across the inner axis, so their DMAs are not
            # re-issued per batch step.
            grid=(n_sp, n_b),
            in_specs=[
                pl.BlockSpec((BT, C, TS), lambda j, b: (b, 0, j)),
                pl.BlockSpec((5, TS), lambda j, b: (0, j)),
                pl.BlockSpec((hidden, 5), lambda j, b: (0, 0)),
                pl.BlockSpec((hidden, 3), lambda j, b: (0, 0)),
            ],
            out_specs=pl.BlockSpec((BT, hidden, TS), lambda j, b: (b, 0, j)),
        ),
        compiler_params=pltpu.CompilerParams(
            dimension_semantics=("parallel", "parallel"),
            vmem_limit_bytes=vmem_limit),
        cost_estimate=cost,
    )(x, grid_t, w_grid, w_in)

    # (B, hidden, H*W) is already NCHW memory layout: reshape is free.
    return out.reshape(B, hidden, H, W)


if __name__ == "__main__":
    B, C, H, W = 2, 3, 16, 16     # Linear(7, hidden): 4 grid + 3 input channels
    hidden = 32

    key = jax.random.PRNGKey(0)
    k_x, k_w, k_b = jax.random.split(key, 3)

    x = jax.random.normal(k_x, (B, C, H, W), dtype=jnp.float32)
    # nn.Linear(7, hidden) parameters in native PyTorch layout.
    weight = jax.random.normal(k_w, (hidden, 7), dtype=jnp.float32) * 0.1
    bias = jax.random.normal(k_b, (hidden,), dtype=jnp.float32) * 0.1

    out = soft_position_embed(x, weight, bias)
    jax.block_until_ready(out)

    # Plain-JAX reference mirroring the PyTorch forward exactly.
    grid_nhwc = jnp.tile(build_grid((H, W)), (B, 1, 1, 1))            # (B,H,W,4)
    feats = jnp.concatenate([grid_nhwc, jnp.transpose(x, (0, 2, 3, 1))], axis=-1)
    ref = jnp.transpose(jnp.einsum("bhwk,nk->bhwn", feats, weight) + bias,
                        (0, 3, 1, 2))

    assert out.shape == (B, hidden, H, W)
    assert jnp.allclose(out, ref, atol=1e-5, rtol=1e-5)

    print("KERNEL_OK")
</pallas_src>

<mosaic_0001>
module attributes {stable_mosaic.version = 11 : i64} {
  func.func @_embed_kernel(%arg0: i32, %arg1: i32, %arg2: memref<1x3x256xf32, #tpu.memory_space<vmem>>, %arg3: memref<5x256xf32, #tpu.memory_space<vmem>>, %arg4: memref<32x5xf32, #tpu.memory_space<vmem>>, %arg5: memref<32x3xf32, #tpu.memory_space<vmem>>, %arg6: memref<1x32x256xf32, #tpu.memory_space<vmem>>) attributes {dimension_semantics = [#tpu.dimension_semantics<parallel>, #tpu.dimension_semantics<parallel>], iteration_bounds = array<i64: 1, 2>, scalar_prefetch = 0 : i64, scratch_operands = 0 : i64, tpu.core_type = #tpu.core_type<tc>, window_params = [{transform_indices = @transform_0, window_bounds = array<i64: 1, 3, 256>}, {transform_indices = @transform_1, window_bounds = array<i64: 5, 256>}, {pipeline_mode = #tpu.pipeline_mode<synchronous>, transform_indices = @transform_2, window_bounds = array<i64: 32, 5>}, {pipeline_mode = #tpu.pipeline_mode<synchronous>, transform_indices = @transform_3, window_bounds = array<i64: 32, 3>}, {transform_indices = @transform_4, window_bounds = array<i64: 1, 32, 256>}]} {
    %c0 = arith.constant 0 : index
    %c0_0 = arith.constant 0 : index
    %0 = vector.load %arg4[%c0, %c0_0] : memref<32x5xf32, #tpu.memory_space<vmem>>, vector<32x5xf32>
    %c0_1 = arith.constant 0 : index
    %c0_2 = arith.constant 0 : index
    %1 = vector.load %arg3[%c0_1, %c0_2] : memref<5x256xf32, #tpu.memory_space<vmem>>, vector<5x256xf32>
    %cst = arith.constant dense<0.000000e+00> : vector<32x256xf32>
    %2 = tpu.matmul %0, %1, %cst {dimension_numbers = #tpu.dot_dimension_numbers<[1], [0], [0], [1], [0, 0, 1, 1], [], []>, precision = #tpu.contract_precision<fp32>} : vector<32x5xf32>, vector<5x256xf32>, vector<32x256xf32> -> vector<32x256xf32>
    %c0_3 = arith.constant 0 : index
    %c0_4 = arith.constant 0 : index
    %3 = vector.load %arg5[%c0_3, %c0_4] : memref<32x3xf32, #tpu.memory_space<vmem>>, vector<32x3xf32>
    %c0_5 = arith.constant 0 : index
    %c0_6 = arith.constant 0 : index
    %c0_7 = arith.constant 0 : index
    %4 = vector.load %arg2[%c0_5, %c0_6, %c0_7] : memref<1x3x256xf32, #tpu.memory_space<vmem>>, vector<1x3x256xf32>
    %5 = vector.shape_cast %4 : vector<1x3x256xf32> to vector<3x256xf32>
    %cst_8 = arith.constant dense<0.000000e+00> : vector<32x256xf32>
    %6 = tpu.matmul %3, %5, %cst_8 {dimension_numbers = #tpu.dot_dimension_numbers<[1], [0], [0], [1], [0, 0, 1, 1], [], []>, precision = #tpu.contract_precision<fp32>} : vector<32x3xf32>, vector<3x256xf32>, vector<32x256xf32> -> vector<32x256xf32>
    %7 = arith.addf %2, %6 : vector<32x256xf32>
    %c0_9 = arith.constant 0 : index
    %c0_10 = arith.constant 0 : index
    %c0_11 = arith.constant 0 : index
    %8 = vector.load %arg6[%c0_9, %c0_10, %c0_11] : memref<1x32x256xf32, #tpu.memory_space<vmem>>, vector<1x32x256xf32>
    %9 = vector.shape_cast %8 : vector<1x32x256xf32> to vector<32x256xf32>
    %10 = vector.shape_cast %7 : vector<32x256xf32> to vector<1x32x256xf32>
    tpu.vector_store %arg6[%c0_9, %c0_10, %c0_11], %10 {strides = array<i32>} : memref<1x32x256xf32, #tpu.memory_space<vmem>>, vector<1x32x256xf32>,
    return
  }
  func.func @transform_0(%arg0: i32, %arg1: i32) -> (i32, i32, i32) {
    %c0_i32 = arith.constant 0 : i32
    %c0_i32_0 = arith.constant 0 : i32
    return %arg1, %c0_i32, %arg0 : i32, i32, i32
  }
  func.func @transform_1(%arg0: i32, %arg1: i32) -> (i32, i32) {
    %c0_i32 = arith.constant 0 : i32
    %c0_i32_0 = arith.constant 0 : i32
    return %c0_i32, %arg0 : i32, i32
  }
  func.func @transform_2(%arg0: i32, %arg1: i32) -> (i32, i32) {
    %c0_i32 = arith.constant 0 : i32
    %c0_i32_0 = arith.constant 0 : i32
    %c0_i32_1 = arith.constant 0 : i32
    return %c0_i32, %c0_i32_0 : i32, i32
  }
  func.func @transform_3(%arg0: i32, %arg1: i32) -> (i32, i32) {
    %c0_i32 = arith.constant 0 : i32
    %c0_i32_0 = arith.constant 0 : i32
    %c0_i32_1 = arith.constant 0 : i32
    return %c0_i32, %c0_i32_0 : i32, i32
  }
  func.func @transform_4(%arg0: i32, %arg1: i32) -> (i32, i32, i32) {
    %c0_i32 = arith.constant 0 : i32
    %c0_i32_0 = arith.constant 0 : i32
    return %arg1, %c0_i32, %arg0 : i32, i32, i32
  }
}

</mosaic_0001>

<bundles_post_ra>
// kernel: tpu_custom_call.1
= control target key start
LH: loop header
LB: loop body
LE: loop exit
PB: predicated region body
PF: predicated region fallthrough
CT: control target
= control target key end

     0   :  { %9 = vsyncpa [#allocation3], 0  ;;  %s2326_s0 = inlined_call_operand.vmem [shape: f32[2,3,256], index: 0, kind: input, shape index: {}]   ;;  %s2327_s1 = inlined_call_operand.vmem [shape: f32[5,256], index: 1, kind: input, shape index: {}]   ;;  %s2328_s2 = inlined_call_operand.vmem [shape: f32[32,5], index: 2, kind: input, shape index: {}]   ;;  %s2329_s3 = inlined_call_operand.vmem [shape: f32[32,3], index: 3, kind: input, shape index: {}]   ;;  %s2330_s4 = inlined_call_operand.hbm [shape: f32[2,32,256], index: 4, kind: output, shape index: {}]  }
   0x1   :  { %11 = vsyncpa [#allocation3 + $0x1], 0  ;;  %s1824_s15 = smov 0   ;;  %s1826_s16 = smov 0  }
   0x2   :  { %s1828_s17 = smov 0   ;;  %s1830_s18 = smov 0  }
   0x3   :  { %s1832_s19 = smov 0   ;;  %s1834_s20 = smov 0  }
   0x4 LB: > { %s1642_s21 = sadd.s32 4294967295, %s1793_s20   ;;  %s1643_s22 = sadd.s32 4294967294, %s1793_s20   ;;  %s1793_s20 = sphi %s1834_s20, %s17_s20   ;;  %s1789_s19 = sphi %s1832_s19, %s2369_s19   ;;  %s1785_s18 = sphi %s1830_s18, %s2368_s18   ;;  %s1781_s17 = sphi %s1828_s17, %s2367_s17   ;;  %s1777_s16 = sphi %s1826_s16, %s2366_s16   ;;  %s1773_s15 = sphi %s1824_s15, %s2365_s15  }
   0x5   : > { %s26_s23 = sadd.s32 1, %s1789_s19  ;;  %s134_s24 = sadd.s32 1, %s1781_s17 }
   0x6   : > { %p27_p0 = scmp.ge.s32.totalorder %s26_s23, 2  ;;  %p144_p1 = scmp.ne.s32.totalorder %s1781_s17, %s1777_s16 }
   0x7   : > { %p145_p2 = scmp.eq.s32.totalorder %s1642_s21, 1  ;;  %p150_p3 = scmp.ne.s32.totalorder %s1777_s16, %s1773_s15 }
   0x8   : > { %s2371_s23 = smov (%p27_p0, %s26_s23), 0  ;;  %p151_p5 = scmp.eq.s32.totalorder %s1643_s22, 1 }
   0x9   : > { %p1864_p4 = por %p145_p2, %p144_p1  ;;  %s129_s26 = ssub.s32 %s1789_s19, %s2371_s23 }
   0xa   : > { %p1647_p6 = scmp.ge.s32.totalorder %s1793_s20, 1  ;;  %p132_p7 = scmp.eq.s32.totalorder %s129_s26, 0 }
   0xb   : > { %p1871_p8 = por %p151_p5, %p150_p3  ;;  %p197_p9 = scmp.lt.s32.totalorder %s1793_s20, 3 }
   0xc   : > { %s1877_s28 = scalar_select %p132_p7, %s1781_s17, %s134_s24  }
   0xd   : > { %p198_p10 = pnand %p1647_p6, %p197_p9 }
   0xf   : > { %201 = sbr.rel (%p198_p10) target bundleno = 345 (0x159), region = 36 }
  0x14   : > { %p233_p11 = scmp.lt.s32.totalorder %s1785_s18, 1  ;;  %v255_v0 = vld [vmem:[%s2329_s3] sm:$0xff]  ;;  %vm262_vm0 = vcmask 23552   ;;  %v256_v1 = vld [vmem:[%s2329_s3 + $0x8] sm:$0xff]  ;;  %v1795_v2 = vmov 0.0   ;;  %v257_v5 = vld [vmem:[%s2329_s3 + $0x10] sm:$0xff] }
  0x15   : > { %346 = vmatprep.mubr.f32.mxu0 %v1795_v2  ;;  %v264_v3 = vsel %vm262_vm0, %v255_v0, 0  ;;  %v267_v4 = vsel %vm262_vm0, %v256_v1, 0  ;;  %465 = vmatprep.mubr.f32.mxu1 %v1795_v2  ;;  %v258_v6 = vld [vmem:[%s2329_s3 + $0x18] sm:$0xff]  ;;  %v270_v9 = vsel %vm262_vm0, %v257_v5, 0  ;;  %vm275_vm1 = vcmask 1042432   ;;  %v249_v53 = vld [vmem:[%s2328_s2] sm:$0xff] }
  0x16   : > { %s234_s11 = scalar_select %p233_p11, %s1785_s18, 1  ;;  %v1895_v7 = vand.u32 4294901760, %v264_v3  ;;  %v1897_v8 = vand.u32 4294901760, %v267_v4  ;;  %v273_v10 = vsel %vm262_vm0, %v258_v6, 0  ;;  %v1899_v11 = vand.u32 4294901760, %v270_v9  ;;  %v250_v56 = vld [vmem:[%s2328_s2 + $0x8] sm:$0xff] }
  0x17   : > { %v1913_v15 = vand.u32 4294901760, %v273_v10  ;;  %vm905_vm2 = vcmask 1044480   ;;  %v254_v37 = vld [vmem:[%s2327_s1 + $0x8] sm:$0x1f]  ;;  %v253_v48 = vld [vmem:[%s2327_s1] sm:$0x1f] }
  0x18   : > { %s1656_s12 = sshll.u32 %s234_s11, 3  ;;  %v1902_v12 = vsub.f32 %v264_v3, %v1895_v7  ;;  %v1905_v13 = vsub.f32 %v267_v4, %v1897_v8  ;;  %v1911_v14 = vsub.f32 %v270_v9, %v1899_v11  ;;  %v910_v40 = vsel %vm905_vm2, %v254_v37, 0  ;;  %v251_v60 = vld [vmem:[%s2328_s2 + $0x10] sm:$0xff]  ;;  %v252_v1 = vld [vmem:[%s2328_s2 + $0x18] sm:$0xff]  ;;  %s1796_s5 = smov [#allocation2]  }
  0x19   : > { %s240_s21 = scalar_lea.vmem %s2326_s0, %s1656_s12  ;;  %v1924_v25 = vsub.f32 %v273_v10, %v1913_v15  ;;  %v1944_v44 = vand.u32 4294901760, %v910_v40  ;;  %v907_v49 = vsel %vm905_vm2, %v253_v48, 0  ;;  %vm892_vm3 = vcmask 39936   ;;  %s229_s12 = sand.u32 1, %s1777_s16  }
  0x1a   : > { %v259_v16 = vld [vmem:[%s240_s21] sm:$0x77]  ;;  %v349_v17 = vand.u32 4294901760, %v1902_v12  ;;  %v360_v18 = vand.u32 4294901760, %v1905_v13  ;;  %v371_v24 = vand.u32 4294901760, %v1911_v14  ;;  %v1973_v51 = vand.u32 4294901760, %v907_v49 }
  0x1b   : > { %v261_v19 = vcombine.high %v259_v16, %v259_v16  ;;  %v276_v20 = vsel %vm275_vm1, %v259_v16, 0  ;;  %v382_v32 = vand.u32 4294901760, %v1924_v25  ;;  %v1951_v46 = vsub.f32 %v910_v40, %v1944_v44  ;;  %s1648_s13 = sshll.u32 %s229_s12, 6  ;;  %s1657_s21 = sshll.u32 %s1785_s18, 10 }
  0x1c   : > { %v1917_v21 = vand.u32 4294901760, %v276_v20  ;;  %v350_v22 = vsub.f32 %v1902_v12, %v349_v17  ;;  %v361_v28 = vsub.f32 %v1905_v13, %v360_v18  ;;  %v372_v36 = vsub.f32 %v1911_v14, %v371_v24  ;;  %s2253_s14 = scalar_lea.vmem [#allocation2], %s1648_s13  ;;  %s2273_s29 = scalar_lea.hbm %s2330_s4, %s1657_s21 }
  0x1d   : > { %v278_v23 = vsel %vm275_vm1, %v261_v19, 0  ;;  %v383_v43 = vsub.f32 %v1924_v25, %v382_v32  ;;  %v1055_v47 = vand.u32 4294901760, %v1951_v46  ;;  %v1984_v54 = vsub.f32 %v907_v49, %v1973_v51  ;;  %s1548_s22 = sshll.u32 %s2253_s14, 4  ;;  %s2281_s18 = scalar_lea.sflag [#allocation3], %s229_s12  ;;  %s2275_s22 = int_to_ptr.vmem [resolvable:$true] %s1548_s22 }
  0x1e   : > { %v310_v26 = vand.u32 4294901760, %v278_v23  ;;  %v351_v27 = vand.u32 4294901760, %v350_v22  ;;  %v428_v29 = vsub.f32 %v276_v20, %v1917_v21  ;;  %v362_v33 = vand.u32 4294901760, %v361_v28  ;;  %s1717_s30 = scalar_lea.vmem %s2275_s22, 1024  ;;  %s1721_s6 = sshll.u32 %s1796_s5, 4  ;;  %s1722_s6 = int_to_ptr.vmem [resolvable:$false] %s1721_s6 }
  0x1f   : > { %v373_v42 = vand.u32 4294901760, %v372_v36  ;;  %v384_v45 = vand.u32 4294901760, %v383_v43  ;;  %v1056_v50 = vsub.f32 %v1951_v46, %v1055_v47  ;;  %v894_v55 = vsel %vm892_vm3, %v249_v53, 0  ;;  %p1718_p12 = scmp.ne.s32.totalorder %s2275_s22, %s1717_s30  ;;  %s1723_s7 = scalar_lea.vmem %s1722_s6, 2048 }
  0x20   : > { %311 = vmatprep.subr.mxu0 %v310_v26  ;;  %v422_v30 = vsub.f32 %v278_v23, %v310_v26  ;;  %v429_v31 = vand.u32 4294901760, %v428_v29  ;;  %v1994_v57 = vand.u32 4294901760, %v894_v55  ;;  %v1061_v58 = vand.u32 4294901760, %v1984_v54  ;;  %p1724_p1 = scmp.lt.s32.totalorder %s2275_s22, %s1722_s6  ;;  %p1725_p2 = scmp.lt.s32.totalorder %s1723_s7, %s1717_s30 }
  0x21   : > { %313 = vmatpush1.msra.mxu0 %v1917_v21  ;;  %v1057_v52 = vand.u32 4294901760, %v1056_v50  ;;  %v897_v59 = vsel %vm892_vm3, %v250_v56, 0  ;;  %v900_v0 = vsel %vm892_vm3, %v251_v60, 0  ;;  %v903_v9 = vsel %vm892_vm3, %v252_v1, 0  ;;  %p1719_p13 = pnand %p1718_p12, %p1864_p4 }
  0x22   : > { %352 = vmatmul.mubr.f32.vlgmr.msra.gmra.mxu0 %v351_v27  ;;  %v423_v34 = vand.u32 4294901760, %v422_v30  ;;  %526 = vmatprep.subr.mxu0 %v422_v30  ;;  %v430_v35 = vsub.f32 %v428_v29, %v429_v31  ;;  %v2007_v61 = vsub.f32 %v894_v55, %v1994_v57  ;;  %v2009_v62 = vand.u32 4294901760, %v897_v59  ;;  %p1726_p3 = por %p1725_p2, %p1724_p1 }
  0x23   : > { %357 = vmatprep.mubr.f32.mxu0 %v1795_v2  ;;  %529 = vmatpush1.msra.mxu0 %v428_v29  ;;  %v1062_v63 = vsub.f32 %v1984_v54, %v1061_v58  ;;  %v2029_v5 = vand.u32 4294901760, %v900_v0  ;;  %p1720_p0 = pneg %p1719_p13 }
  0x24   : > { %v424_v38 = vsub.f32 %v422_v30, %v423_v34  ;;  %731 = vmatprep.subr.mxu0 %v423_v34  ;;  %v431_v39 = vand.u32 4294901760, %v430_v35  ;;  %v981_v3 = vand.u32 4294901760, %v2007_v61  ;;  %v2027_v4 = vsub.f32 %v897_v59, %v2009_v62 }
  0x25   : > { %v1063_v6 = vand.u32 4294901760, %v1062_v63  ;;  %p1727_p5 = pnand %p1726_p3, %p1720_p0 }
  0x26   : > { %363 = vmatmul.mubr.f32.gmra.mxu0 %v362_v33  ;;  %v425_v41 = vand.u32 4294901760, %v424_v38  ;;  %v982_v10 = vsub.f32 %v2007_v61, %v981_v3 }
  0x27   : > { %368 = vmatprep.mubr.f32.mxu0 %v1795_v2 }
  0x28   : > { %426 = vmatprep.subr.mxu1 %v425_v41 }
  0x29   : > { %432 = vmatpush1.msra.mxu1 %v431_v39 }
  0x2a   : > { %374 = vmatmul.mubr.f32.gmra.mxu0 %v373_v42  ;;  %467 = vmatmul.mubr.f32.vlgmr.msra.gmra.mxu1 %v1895_v7 }
  0x2b   : > { %626 = vmatprep.subr.mxu1 %v310_v26  ;;  %379 = vmatprep.mubr.f32.mxu0 %v1795_v2 }
  0x2c   : > { %628 = vmatpush1.msra.mxu1 %v1917_v21  ;;  %472 = vmatprep.mubr.f32.mxu1 %v1795_v2 }
  0x2d   : > { %828 = vmatprep.subr.mxu1 %v310_v26 }
  0x2e   : > { %385 = vmatmul.mubr.f32.gmra.mxu0 %v384_v45  ;;  %474 = vmatmul.mubr.f32.gmra.mxu1 %v1897_v8 }
  0x2f   : > { %479 = vmatprep.mubr.f32.mxu1 %v1795_v2  ;;  %562 = vmatprep.mubr.f32.mxu0 %v1795_v2 }
  0x32   : > { %481 = vmatmul.mubr.f32.gmra.mxu1 %v1899_v11  ;;  %565 = vmatmul.mubr.f32.vlgmr.msra.gmra.mxu0 %v1902_v12  ;;  %v992_v12 = vand.u32 4294901760, %v2027_v4 }
  0x33   : > { %486 = vmatprep.mubr.f32.mxu1 %v1795_v2  ;;  %570 = vmatprep.mubr.f32.mxu0 %v1795_v2 }
  0x34   : > { %735 = vmatpush1.msra.mxu0 %v429_v31  ;;  %v993_v16 = vsub.f32 %v2027_v4, %v992_v12 }
  0x35   : > { %943 = vmatprep.subr.mxu0 %v1944_v44 }
  0x36   : > { %488 = vmatmul.mubr.f32.gmra.mxu1 %v1913_v15  ;;  %573 = vmatmul.mubr.f32.gmra.mxu0 %v1905_v13  ;;  %v1002_v13 = vsub.f32 %v900_v0, %v2029_v5  ;;  %v994_v19 = vand.u32 4294901760, %v993_v16 }
  0x37   : > { %578 = vmatprep.mubr.f32.mxu0 %v1795_v2  ;;  %661 = vmatprep.mubr.f32.mxu1 %v1795_v2 }
  0x3a   : > { %581 = vmatmul.mubr.f32.gmra.mxu0 %v1911_v14  ;;  %665 = vmatmul.mubr.f32.vlgmr.msra.gmra.mxu1 %v349_v17  ;;  %v2039_v14 = vand.u32 4294901760, %v903_v9  ;;  %v1003_v17 = vand.u32 4294901760, %v1002_v13 }
  0x3b   : > { %830 = vmatpush1.msra.mxu1 %v1917_v21  ;;  %586 = vmatprep.mubr.f32.mxu0 %v1795_v2 }
  0x3c   : > { %670 = vmatprep.mubr.f32.mxu1 %v1795_v2  ;;  %1058 = vmatprep.subr.mxu1 %v1057_v52  ;;  %v1004_v20 = vsub.f32 %v1002_v13, %v1003_v17 }
  0x3e   : > { %589 = vmatmul.mubr.f32.gmra.mxu0 %v1924_v25  ;;  %674 = vmatmul.mubr.f32.gmra.mxu1 %v360_v18  ;;  %v1013_v18 = vsub.f32 %v903_v9, %v2039_v14 }
  0x3f   : > { %679 = vmatprep.mubr.f32.mxu1 %v1795_v2  ;;  %768 = vmatprep.mubr.f32.mxu0 %v1795_v2 }
  0x40   : > { %v1014_v21 = vand.u32 4294901760, %v1013_v18 }
  0x42   : > { %683 = vmatmul.mubr.f32.gmra.mxu1 %v371_v24  ;;  %770 = vmatmul.mubr.f32.vlgmr.msra.gmra.mxu0 %v1895_v7  ;;  %v1015_v22 = vsub.f32 %v1013_v18, %v1014_v21 }
  0x43   : > { %688 = vmatprep.mubr.f32.mxu1 %v1795_v2  ;;  %775 = vmatprep.mubr.f32.mxu0 %v1795_v2 }
  0x44   : > { %945 = vmatpush1.msra.mxu0 %v1973_v51 }
  0x45   : > { %1158 = vmatprep.subr.mxu0 %v1951_v46 }
  0x46   : > { %692 = vmatmul.mubr.f32.gmra.mxu1 %v382_v32  ;;  %777 = vmatmul.mubr.f32.gmra.mxu0 %v1897_v8 }
  0x47   : > { %782 = vmatprep.mubr.f32.mxu0 %v1795_v2  ;;  %863 = vmatprep.mubr.f32.mxu1 %v1795_v2 }
  0x4a   : > { %784 = vmatmul.mubr.f32.gmra.mxu0 %v1899_v11  ;;  %865 = vmatmul.mubr.f32.vlgmr.msra.gmra.mxu1 %v1895_v7  ;;  %v983_v7 = vand.u32 4294901760, %v982_v10 }
  0x4b   : > { %1064 = vmatpush1.msra.mxu1 %v1063_v6  ;;  %789 = vmatprep.mubr.f32.mxu0 %v1795_v2 }
  0x4c   : > { %870 = vmatprep.mubr.f32.mxu1 %v1795_v2  ;;  %1258 = vmatprep.subr.mxu1 %v1944_v44 }
  0x4e   : > { %791 = vmatmul.mubr.f32.gmra.mxu0 %v1913_v15  ;;  %872 = vmatmul.mubr.f32.gmra.mxu1 %v1897_v8  ;;  %v1005_v8 = vand.u32 4294901760, %v1004_v20 }
  0x4f   : > { %877 = vmatprep.mubr.f32.mxu1 %v1795_v2  ;;  %978 = vmatprep.mubr.f32.mxu0 %v1795_v2 }
  0x52   : > { %879 = vmatmul.mubr.f32.gmra.mxu1 %v1899_v11  ;;  %984 = vmatmul.mubr.f32.vlgmr.msra.gmra.mxu0 %v983_v7  ;;  %v1016_v11 = vand.u32 4294901760, %v1015_v22 }
  0x53   : > { %884 = vmatprep.mubr.f32.mxu1 %v1795_v2  ;;  %989 = vmatprep.mubr.f32.mxu0 %v1795_v2 }
  0x54   : > { %1161 = vmatpush1.msra.mxu0 %v1984_v54 }
  0x55   : > { %1363 = vmatprep.subr.mxu0 %v1055_v47 }
  0x56   : > { %886 = vmatmul.mubr.f32.gmra.mxu1 %v1913_v15  ;;  %995 = vmatmul.mubr.f32.gmra.mxu0 %v994_v19 }
  0x57   : > { %1000 = vmatprep.mubr.f32.mxu0 %v1795_v2  ;;  %1097 = vmatprep.mubr.f32.mxu1 %v1795_v2 }
  0x5a   : > { %1006 = vmatmul.mubr.f32.gmra.mxu0 %v1005_v8  ;;  %1099 = vmatmul.mubr.f32.vlgmr.msra.gmra.mxu1 %v1994_v57 }
  0x5b   : > { %1260 = vmatpush1.msra.mxu1 %v1973_v51  ;;  %1011 = vmatprep.mubr.f32.mxu0 %v1795_v2 }
  0x5c   : > { %1104 = vmatprep.mubr.f32.mxu1 %v1795_v2  ;;  %1460 = vmatprep.subr.mxu1 %v1944_v44 }
  0x5e   : > { %1017 = vmatmul.mubr.f32.gmra.mxu0 %v1016_v11  ;;  %1106 = vmatmul.mubr.f32.gmra.mxu1 %v2009_v62 }
  0x5f   : > { %1111 = vmatprep.mubr.f32.mxu1 %v1795_v2  ;;  %1194 = vmatprep.mubr.f32.mxu0 %v1795_v2 }
  0x62   : > { %1113 = vmatmul.mubr.f32.gmra.mxu1 %v2029_v5  ;;  %1197 = vmatmul.mubr.f32.vlgmr.msra.gmra.mxu0 %v2007_v61 }
  0x63   : > { %1118 = vmatprep.mubr.f32.mxu1 %v1795_v2  ;;  %1202 = vmatprep.mubr.f32.mxu0 %v1795_v2 }
  0x64   : > { %1367 = vmatpush1.msra.mxu0 %v1061_v58 }
  0x66   : > { %1120 = vmatmul.mubr.f32.gmra.mxu1 %v2039_v14  ;;  %1205 = vmatmul.mubr.f32.gmra.mxu0 %v2027_v4 }
  0x67   : > { %1210 = vmatprep.mubr.f32.mxu0 %v1795_v2  ;;  %1293 = vmatprep.mubr.f32.mxu1 %v1795_v2 }
  0x6a   : > { %1213 = vmatmul.mubr.f32.gmra.mxu0 %v1002_v13  ;;  %1297 = vmatmul.mubr.f32.vlgmr.msra.gmra.mxu1 %v981_v3 }
  0x6b   : > { %1462 = vmatpush1.msra.mxu1 %v1973_v51  ;;  %1218 = vmatprep.mubr.f32.mxu0 %v1795_v2 }
  0x6c   : > { %1302 = vmatprep.mubr.f32.mxu1 %v1795_v2 }
  0x6e   : > { %1221 = vmatmul.mubr.f32.gmra.mxu0 %v1013_v18  ;;  %1306 = vmatmul.mubr.f32.gmra.mxu1 %v992_v12 }
  0x6f   : > { %1311 = vmatprep.mubr.f32.mxu1 %v1795_v2  ;;  %1400 = vmatprep.mubr.f32.mxu0 %v1795_v2 }
  0x72   : > { %1315 = vmatmul.mubr.f32.gmra.mxu1 %v1003_v17  ;;  %1402 = vmatmul.mubr.f32.vlgmr.msra.gmra.mxu0 %v1994_v57 }
  0x73   : > { %1320 = vmatprep.mubr.f32.mxu1 %v1795_v2  ;;  %1407 = vmatprep.mubr.f32.mxu0 %v1795_v2 }
  0x76   : > { %1324 = vmatmul.mubr.f32.gmra.mxu1 %v1014_v21  ;;  %1409 = vmatmul.mubr.f32.gmra.mxu0 %v2009_v62 }
  0x77   : > { %1414 = vmatprep.mubr.f32.mxu0 %v1795_v2  ;;  %1495 = vmatprep.mubr.f32.mxu1 %v1795_v2 }
  0x7a   : > { %1416 = vmatmul.mubr.f32.gmra.mxu0 %v2029_v5  ;;  %1497 = vmatmul.mubr.f32.vlgmr.msra.gmra.mxu1 %v1994_v57 }
  0x7b   : > { %1421 = vmatprep.mubr.f32.mxu0 %v1795_v2  ;;  %1502 = vmatprep.mubr.f32.mxu1 %v1795_v2 }
  0x7e   : > { %1423 = vmatmul.mubr.f32.gmra.mxu0 %v2039_v14  ;;  %1504 = vmatmul.mubr.f32.gmra.mxu1 %v2009_v62 }
  0x7f   : > { %1509 = vmatprep.mubr.f32.mxu1 %v1795_v2 }
  0x82   : > { %1511 = vmatmul.mubr.f32.gmra.mxu1 %v2029_v5 }
  0x83   : > { %1516 = vmatprep.mubr.f32.mxu1 %v1795_v2 }
  0x86   : > { %1518 = vmatmul.mubr.f32.gmra.mxu1 %v2039_v14 }
  0xe2   : > { %v2098_v15 = vpop.f32.mrf.mxu0 }
  0xe4   : > { %v2100_v23 = vpop.f32.mrf.mxu0 }
  0xe6   : > { %v2102_v24 = vpop.f32.mrf.mxu0 }
  0xe8   : > { %v2104_v25 = vpop.f32.mrf.mxu0 }
  0xea   : > { %v2106_v26 = vpop.f32.mrf.mxu0  ;;  %v468_v27 = vpop.f32.mrf.mxu1 }
  0xec   : > { %v2108_v28 = vpop.f32.mrf.mxu0  ;;  %v470_v29 = vpop.f32.mrf.mxu1 }
  0xee   : > { %v2110_v30 = vpop.f32.mrf.mxu0  ;;  %v2112_v31 = vpop.f32.mrf.mxu1 }
  0xf0   : > { %v2114_v2 = vpop.f32.mrf.mxu0  ;;  %v2116_v32 = vpop.f32.mrf.mxu1 }
  0xf2   : > { %v2118_v33 = vpop.f32.mrf.mxu1  ;;  %v566_v34 = vpop.f32.mrf.mxu0 }
  0xf4   : > { %v2120_v35 = vpop.f32.mrf.mxu1  ;;  %v568_v36 = vpop.f32.mrf.mxu0 }
  0xf6   : > { %v2122_v37 = vpop.f32.mrf.mxu1  ;;  %v574_v38 = vpop.f32.mrf.mxu0 }
  0xf8   : > { %v2124_v39 = vpop.f32.mrf.mxu1  ;;  %v2126_v40 = vpop.f32.mrf.mxu0 }
  0xfa   : > { %v2128_v41 = vpop.f32.mrf.mxu0  ;;  %v666_v42 = vpop.f32.mrf.mxu1 }
  0xfc   : > { %v2130_v43 = vpop.f32.mrf.mxu0  ;;  %v668_v44 = vpop.f32.mrf.mxu1 }
  0xfe   : > { %v2132_v45 = vpop.f32.mrf.mxu0  ;;  %v675_v46 = vpop.f32.mrf.mxu1 }
 0x100   : > { %v2134_v47 = vpop.f32.mrf.mxu0  ;;  %v2136_v48 = vpop.f32.mrf.mxu1 }
 0x102   : > { %v2138_v49 = vpop.f32.mrf.mxu1  ;;  %v771_v50 = vpop.f32.mrf.mxu0 }
 0x104   : > { %v2140_v51 = vpop.f32.mrf.mxu1  ;;  %v773_v52 = vpop.f32.mrf.mxu0 }
 0x106   : > { %v2142_v53 = vpop.f32.mrf.mxu1  ;;  %v778_v54 = vpop.f32.mrf.mxu0 }
 0x108   : > { %v2144_v55 = vpop.f32.mrf.mxu1  ;;  %v2146_v56 = vpop.f32.mrf.mxu0 }
 0x10a   : > { %v2148_v57 = vpop.f32.mrf.mxu0  ;;  %v866_v58 = vpop.f32.mrf.mxu1 }
 0x10c   : > { %v2150_v59 = vpop.f32.mrf.mxu0  ;;  %v868_v60 = vpop.f32.mrf.mxu1 }
 0x10e   : > { %v2152_v61 = vpop.f32.mrf.mxu0  ;;  %v873_v62 = vpop.f32.mrf.mxu1 }
 0x10f   : > { %2333 = vst [vmem:[#allocation5_spill] sm:$0xff] %v2152_v61 }
 0x110   : > { %v2154_v63 = vpop.f32.mrf.mxu0  ;;  %v2156_v0 = vpop.f32.mrf.mxu1 }
 0x111   : > { %2334 = vst [vmem:[#allocation6_spill] sm:$0xff] %v2154_v63 }
 0x112   : > { %v2158_v1 = vpop.f32.mrf.mxu1  ;;  %v985_v3 = vpop.f32.mrf.mxu0 }
 0x114   : > { %v2160_v4 = vpop.f32.mrf.mxu1  ;;  %v987_v5 = vpop.f32.mrf.mxu0 }
 0x115   : > { %2335 = vst [vmem:[#allocation7_spill] sm:$0xff] %v2160_v4 }
 0x116   : > { %v2162_v6 = vpop.f32.mrf.mxu1  ;;  %v2164_v9 = vpop.f32.mrf.mxu0 }
 0x117   : > { %2336 = vst [vmem:[#allocation8_spill] sm:$0xff] %v2162_v6 }
 0x118   : > { %v2166_v10 = vpop.f32.mrf.mxu1  ;;  %v2168_v12 = vpop.f32.mrf.mxu0 }
 0x119   : > { %2337 = vst [vmem:[#allocation9_spill] sm:$0xff] %v2166_v10 }
 0x11a   : > { %v2170_v13 = vpop.f32.mrf.mxu0  ;;  %v1100_v14 = vpop.f32.mrf.mxu1 }
 0x11b   : > { %2338 = vst [vmem:[#allocation10_spill] sm:$0xff] %v2170_v13 }
 0x11c   : > { %v2172_v7 = vpop.f32.mrf.mxu0  ;;  %v1102_v16 = vpop.f32.mrf.mxu1 }
 0x11d   : > { %2339 = vst [vmem:[#allocation11_spill] sm:$0xff] %v2172_v7  ;;  %v469_v7 = vadd.f32 %v468_v27, %v2098_v15  ;;  %v478_v15 = vadd.f32 %v2116_v32, %v2104_v25 }
 0x11e   : > { %v2174_v17 = vpop.f32.mrf.mxu0  ;;  %v2176_v18 = vpop.f32.mrf.mxu1 }
 0x11f   : > { %2340 = vst [vmem:[#allocation12_spill] sm:$0xff] %v2174_v17  ;;  %v567_v13 = vadd.f32 %v566_v34, %v469_v7  ;;  %v577_v7 = vadd.f32 %v2126_v40, %v478_v15  ;;  %v490_v40 = vadd.f32 %v2122_v37, %v2110_v30 }
 0x120   : > { %v2178_v19 = vpop.f32.mrf.mxu0  ;;  %v2180_v20 = vpop.f32.mrf.mxu1 }
 0x121   : > { %2341 = vst [vmem:[#allocation13_spill] sm:$0xff] %v2178_v19  ;;  %2342 = vst [vmem:[#allocation14_spill] sm:$0xff] %v2180_v20  ;;  %v471_v19 = vadd.f32 %v470_v29, %v2100_v23  ;;  %v667_v61 = vadd.f32 %v666_v42, %v567_v13  ;;  %v483_v23 = vadd.f32 %v2118_v33, %v2106_v26 }
 0x122   : > { %v2182_v21 = vpop.f32.mrf.mxu1  ;;  %v1198_v8 = vpop.f32.mrf.mxu0  ;;  %v485_v42 = vadd.f32 %v2120_v35, %v2108_v28 }
 0x123   : > { %2343 = vst [vmem:[#allocation15_spill] sm:$0xff] %v2182_v21  ;;  %v569_v4 = vadd.f32 %v568_v36, %v471_v19  ;;  %v583_v13 = vadd.f32 %v2128_v41, %v483_v23  ;;  %v2351_v19 = vld [vmem:[#allocation10_spill] sm:$0xff] }
 0x124   : > { %v2184_v22 = vpop.f32.mrf.mxu1  ;;  %v1200_v11 = vpop.f32.mrf.mxu0 }
 0x125   : > { %2344 = vst [vmem:[#allocation16_spill] sm:$0xff] %v2184_v22  ;;  %v476_v22 = vadd.f32 %v2112_v31, %v2102_v24 }
 0x126   : > { %v2186_v10 = vpop.f32.mrf.mxu1  ;;  %v2188_v6 = vpop.f32.mrf.mxu0 }
 0x127   : > { %2345 = vst [vmem:[#allocation17_spill] sm:$0xff] %v2186_v10  ;;  %2346 = vst [vmem:[#allocation18_spill] sm:$0xff] %v2188_v6  ;;  %v575_v27 = vadd.f32 %v574_v38, %v476_v22  ;;  %v678_v38 = vadd.f32 %v2136_v48, %v577_v7  ;;  %v492_v48 = vadd.f32 %v2124_v39, %v2114_v2  ;;  %v2355_v7 = vld [vmem:[#allocation8_spill] sm:$0xff] }
 0x128   : > { %v2191_v63 = vpop.f32.mrf.mxu1  ;;  %v2193_v17 = vpop.f32.mrf.mxu0  ;;  %v2352_v22 = vld [vmem:[#allocation14_spill] sm:$0xff] }
 0x129   : > { %2347 = vst [vmem:[#allocation19_spill] sm:$0xff] %v2191_v63  ;;  %2348 = vst [vmem:[#allocation20_spill] sm:$0xff] %v2193_v17  ;;  %v669_v63 = vadd.f32 %v668_v44, %v569_v4  ;;  %v772_v17 = vadd.f32 %v771_v50, %v667_v61  ;;  %v676_v24 = vadd.f32 %v675_v46, %v575_v27 }
 0x12a   : > { %v2196_v20 = vpop.f32.mrf.mxu0  ;;  %v1298_v21 = vpop.f32.mrf.mxu1  ;;  %v585_v46 = vadd.f32 %v2130_v43, %v485_v42  ;;  %v685_v50 = vadd.f32 %v2138_v49, %v583_v13  ;;  %v781_v35 = vadd.f32 %v2146_v56, %v678_v38 }
 0x12b   : > { %v774_v31 = vadd.f32 %v773_v52, %v669_v63  ;;  %v867_v36 = vadd.f32 %v866_v58, %v772_v17  ;;  %v779_v44 = vadd.f32 %v778_v54, %v676_v24  ;;  %v591_v54 = vadd.f32 %v2132_v45, %v490_v40  ;;  %v2350_v17 = vld [vmem:[#allocation7_spill] sm:$0xff] }
 0x12c   : > { %v2200_v10 = vpop.f32.mrf.mxu0  ;;  %v1300_v6 = vpop.f32.mrf.mxu1  ;;  %v786_v30 = vadd.f32 %v2148_v57, %v685_v50  ;;  %v876_v49 = vadd.f32 %v2156_v0, %v781_v35  ;;  %v2359_v50 = vld [vmem:[#allocation9_spill] sm:$0xff] }
 0x12d   : > { %v869_v26 = vadd.f32 %v868_v60, %v774_v31  ;;  %v986_v33 = vadd.f32 %v985_v3, %v867_v36  ;;  %v874_v41 = vadd.f32 %v873_v62, %v779_v44  ;;  %v687_v60 = vadd.f32 %v2140_v51, %v585_v46  ;;  %v2356_v31 = vld [vmem:[#allocation11_spill] sm:$0xff] }
 0x12e   : > { %v2206_v29 = vpop.f32.mrf.mxu0  ;;  %v1307_v34 = vpop.f32.mrf.mxu1  ;;  %v593_v3 = vadd.f32 %v2134_v47, %v492_v48  ;;  %v694_v2 = vadd.f32 %v2142_v53, %v591_v54  ;;  %v881_v45 = vadd.f32 %v2158_v1, %v786_v30  ;;  %v999_v4 = vadd.f32 %v2168_v12, %v876_v49  ;;  %v2353_v27 = vld [vmem:[#allocation18_spill] sm:$0xff]  ;;  %v2357_v36 = vld [vmem:[#allocation15_spill] sm:$0xff] }
 0x12f   : > { %v988_v58 = vadd.f32 %v987_v5, %v869_v26  ;;  %v1101_v61 = vadd.f32 %v1100_v14, %v986_v33  ;;  %v997_v56 = vadd.f32 %v2164_v9, %v874_v41  ;;  %v788_v39 = vadd.f32 %v2150_v59, %v687_v60  ;;  %v2360_v41 = vld [vmem:[#allocation12_spill] sm:$0xff] }
 0x130   : > { %v2212_v25 = vpop.f32.mrf.mxu0  ;;  %v1309_v32 = vpop.f32.mrf.mxu1  ;;  %v696_v9 = vadd.f32 %v2144_v55, %v593_v3  ;;  %v1008_v59 = vadd.f32 %v2351_v19, %v881_v45  ;;  %v1110_v15 = vadd.f32 %v2352_v22, %v999_v4  ;;  %v2358_v44 = vld [vmem:[#allocation20_spill] sm:$0xff] }
 0x131   : > { %v1103_v62 = vadd.f32 %v1102_v16, %v988_v58  ;;  %v1199_v63 = vadd.f32 %v1198_v8, %v1101_v61  ;;  %v1108_v5 = vadd.f32 %v2176_v18, %v997_v56  ;;  %v2349_v16 = vld [vmem:[#allocation5_spill] sm:$0xff]  ;;  %v883_v53 = vadd.f32 %v2350_v17, %v788_v39  ;;  %v2364_v39 = vld [vmem:[#allocation19_spill] sm:$0xff] }
 0x132   : > { %v2219_v52 = vpop.f32.mrf.mxu1  ;;  %v1403_v28 = vpop.f32.mrf.mxu0  ;;  %v793_v47 = vadd.f32 %v2349_v16, %v694_v2  ;;  %v1115_v42 = vadd.f32 %v2357_v36, %v1008_v59  ;;  %v1209_v26 = vadd.f32 %v2358_v44, %v1110_v15  ;;  %v2363_v56 = vld [vmem:[#allocation17_spill] sm:$0xff] }
 0x133   : > { %v1201_v14 = vadd.f32 %v1200_v11, %v1103_v62  ;;  %v1299_v0 = vadd.f32 %v1298_v21, %v1199_v63  ;;  %v1207_v12 = vadd.f32 %v2353_v27, %v1108_v5  ;;  %v2354_v11 = vld [vmem:[#allocation6_spill] sm:$0xff]  ;;  %v1010_v55 = vadd.f32 %v2356_v31, %v883_v53 }
 0x134   : > { %v1318_v37 = vpop.f32.mrf.mxu1  ;;  %v1405_v43 = vpop.f32.mrf.mxu0  ;;  %v795_v21 = vadd.f32 %v2354_v11, %v696_v9  ;;  %v888_v24 = vadd.f32 %v2355_v7, %v793_v47  ;;  %v1215_v54 = vadd.f32 %v2196_v20, %v1115_v42  ;;  %v1310_v60 = vadd.f32 %v1309_v32, %v1209_v26 }
 0x135   : > { %v1301_v23 = vadd.f32 %v1300_v6, %v1201_v14  ;;  %v1404_v18 = vadd.f32 %v1403_v28, %v1299_v0  ;;  %v1308_v33 = vadd.f32 %v1307_v34, %v1207_v12  ;;  %v2361_v28 = vld [vmem:[#allocation16_spill] sm:$0xff] }
 0x136   : > { %v1325_v51 = vpop.f32.mrf.mxu1  ;;  %v1410_v57 = vpop.f32.mrf.mxu0  ;;  %v890_v35 = vadd.f32 %v2359_v50, %v795_v21  ;;  %v1019_v6 = vadd.f32 %v2360_v41, %v888_v24  ;;  %v1117_v58 = vadd.f32 %v2361_v28, %v1010_v55  ;;  %v1317_v2 = vadd.f32 %v2219_v52, %v1215_v54 }
 0x137   : > { %v1406_v40 = vadd.f32 %v1405_v43, %v1301_v23  ;;  %v1411_v30 = vadd.f32 %v1410_v57, %v1308_v33  ;;  %v2362_v43 = vld [vmem:[#allocation13_spill] sm:$0xff] }
 0x138   : > { %v1327_v8 = vpop.f32.mrf.mxu1  ;;  %v1412_v1 = vpop.f32.mrf.mxu0  ;;  %v1021_v49 = vadd.f32 %v2362_v43, %v890_v35  ;;  %v1122_v62 = vadd.f32 %v2363_v56, %v1019_v6  ;;  %v1217_v3 = vadd.f32 %v2200_v10, %v1117_v58 }
 0x139   : > { %v1413_v20 = vadd.f32 %v1412_v1, %v1310_v60 }
 0x13a   : > { %v1417_v13 = vpop.f32.mrf.mxu0  ;;  %v1498_v38 = vpop.f32.mrf.mxu1  ;;  %v1124_v45 = vadd.f32 %v2364_v39, %v1021_v49  ;;  %v1223_v5 = vadd.f32 %v2206_v29, %v1122_v62  ;;  %v1319_v14 = vadd.f32 %v1318_v37, %v1217_v3 }
 0x13b   : > { %v1499_v46 = vadd.f32 %v1498_v38, %v1404_v18  ;;  %v1418_v0 = vadd.f32 %v1417_v13, %v1317_v2 }
 0x13c   : > { %v1419_v61 = vpop.f32.mrf.mxu0  ;;  %v1500_v48 = vpop.f32.mrf.mxu1  ;;  %v1225_v52 = vadd.f32 %v2212_v25, %v1124_v45  ;;  %v1326_v16 = vadd.f32 %v1325_v51, %v1223_v5 }
 0x13d   : > { %1524 = vst [vmem:[%s2253_s14] sm:$0xff] %v1499_v46  ;;  %v1501_v34 = vadd.f32 %v1500_v48, %v1406_v40  ;;  %v1420_v47 = vadd.f32 %v1419_v61, %v1319_v14 }
 0x13e   : > { %v1505_v63 = vpop.f32.mrf.mxu1  ;;  %v1424_v57 = vpop.f32.mrf.mxu0  ;;  %v1328_v59 = vadd.f32 %v1327_v8, %v1225_v52 }
 0x13f   : > { %1525 = vst [vmem:[%s2253_s14 + $0x8] sm:$0xff] %v1501_v34  ;;  %v1506_v32 = vadd.f32 %v1505_v63, %v1411_v30  ;;  %v1425_v29 = vadd.f32 %v1424_v57, %v1326_v16 }
 0x140   : > { %v1507_v4 = vpop.f32.mrf.mxu1  ;;  %v1426_v53 = vpop.f32.mrf.mxu0 }
 0x141   : > { %1526 = vst [vmem:[%s2253_s14 + $0x10] sm:$0xff] %v1506_v32  ;;  %v1508_v9 = vadd.f32 %v1507_v4, %v1413_v20  ;;  %v1427_v22 = vadd.f32 %v1426_v53, %v1328_v59 }
 0x142   : > { %v1512_v10 = vpop.f32.mrf.mxu1 }
 0x143   : > { %1527 = vst [vmem:[%s2253_s14 + $0x18] sm:$0xff] %v1508_v9  ;;  %v1513_v17 = vadd.f32 %v1512_v10, %v1418_v0 }
 0x144   : > { %v1514_v19 = vpop.f32.mrf.mxu1 }
 0x145   : > { %1528 = vst [vmem:[%s2253_s14 + $0x20] sm:$0xff] %v1513_v17  ;;  %v1515_v37 = vadd.f32 %v1514_v19, %v1420_v47 }
 0x146   : > { %v1519_v1 = vpop.f32.mrf.mxu1 }
 0x147   : > { %1529 = vst [vmem:[%s2253_s14 + $0x28] sm:$0xff] %v1515_v37  ;;  %v1520_v25 = vadd.f32 %v1519_v1, %v1425_v29 }
 0x148   : > { %v1521_v51 = vpop.f32.mrf.mxu1 }
 0x149   : > { %1530 = vst [vmem:[%s2253_s14 + $0x30] sm:$0xff] %v1520_v25  ;;  %v1522_v8 = vadd.f32 %v1521_v51, %v1427_v22 }
 0x14b   : > { %1531 = vst [vmem:[%s2253_s14 + $0x38] sm:$0xff] %v1522_v8 }
 0x14c   : > { %1730 = shalt.err (!%p1727_p5)
}
 0x14d   : > { %s1731_s8 = scalar_lea.hbm %s2273_s29, 1024  ;;  %s1735_s11 = scalar_lea.hbm %s2330_s4, 2048 }
 0x14e   : > { %p1732_p6 = scmp.ne.s32.totalorder %s2273_s29, %s1731_s8  ;;  %p1736_p10 = scmp.lt.s32.totalorder %s2273_s29, %s2330_s4 }
 0x14f   : > { %p1737_p11 = scmp.lt.s32.totalorder %s1735_s11, %s1731_s8 }
 0x150   : > { %p1733_p7 = pnand %p1732_p6, %p1864_p4 }
 0x151   : > { %p1738_p12 = por %p1737_p11, %p1736_p10 }
 0x152   : > { %p1734_p9 = pneg %p1733_p7 }
 0x154   : > { %p1739_p13 = pnand %p1738_p12, %p1734_p9 }
 0x156   : > { %1742 = shalt.err (!%p1739_p13)
}
 0x157   : > { %s1797_s14 = smov 256   ;;  %s1798_s21 = smov 16  }
 0x158   : > { %1658 = dma.vmem_to_hbm [thread:$0]  (%p1864_p4), %s2275_s22, 1024, %s2273_s29, %s2281_s18, %s1797_s14, %s1797_s14, %s1798_s21  }
 0x159 PF: > { %p1664_p0 = scmp.ge.s32.totalorder %s1793_s20, 2  ;;  %s1563_s24 = sand.u32 1, %s1773_s15  }
 0x15a   : > { %s1564_s26 = scalar_lea.sflag [#allocation3], %s1563_s24 }
 0x15b   : > { %p1661_p1 = pnand %p1664_p0, %p1871_p8 }
 0x15d   : > { %p1662_p2 = pneg %p1661_p1 }
 0x15f   : > { %1768 = dma.done.wait (%p1662_p2), %s1564_s26, 1024  }
 0x160   : > { %1770 = vsyncadd (%p1662_p2), %s1564_s26, 4294966272  ;;  %s17_s20 = sadd.s32 1, %s1793_s20   ;;  %s2365_s15 = smov %s1777_s16 }
 0x161   : > { %p14_p3 = scmp.ge.s32.totalorder %s17_s20, 4   ;;  %s2366_s16 = smov %s1781_s17 }
 0x162   : > { %s2367_s17 = smov %s1877_s28  ;;  %s2368_s18 = smov %s1789_s19 }
 0x163   : > { %s2369_s19 = smov %s2371_s23  ;;  %16 = sbr.rel (!%p14_p3) target bundleno = 4 (0x4), region = 74 }
 0x168   :  { %1569 = vsyncpa [#allocation3], 1 }
 0x169   :  { %1571 = vsyncpa [#allocation3 + $0x1], 1 }

</bundles_post_ra>
